<compile_context>
chip_gen: v7x
topology: tpu7x:2x2x1
jax: 0.10.0
libtpu: 0.0.40
codegen_flags: <defaults>
</compile_context>

<pallas_src>
import functools

import jax
import jax.numpy as jnp
from jax import lax
from jax.experimental import pallas as pl
from jax.experimental.pallas import tpu as pltpu


def _head_kernel(x_ref, wqkv_ref, o_ref, *, seq_len, head_size, batch_block):
    """x_ref: (Bb*T, C) rows; wqkv_ref: (C, 3H) = [Wq*scale | Wk | Wv]; o_ref: (Bb*T, H)."""
    T, H, Bb = seq_len, head_size, batch_block

    x = x_ref[...]            # native dtype, no up-cast (f32 accumulation requested below)
    w = wqkv_ref[...]

    # Fused q/k/v projection for all Bb batch elements at once: (Bb*T, 3H).
    qkv = jnp.dot(x, w, preferred_element_type=jnp.float32)

    # Causal mask, hoisted out of the per-batch loop (diagonal kept -> no all -inf rows).
    row = lax.broadcasted_iota(jnp.int32, (T, T), 0)
    col = lax.broadcasted_iota(jnp.int32, (T, T), 1)
    causal = col <= row

    for b in range(Bb):       # static unroll; Bb is small (capped in the wrapper)
        r0 = b * T
        q = qkv[r0:r0 + T, 0 * H:1 * H]      # (T, H), already scaled by H**-0.5
        k = qkv[r0:r0 + T, 1 * H:2 * H]
        v = qkv[r0:r0 + T, 2 * H:3 * H]

        # q @ k^T without an explicit transpose: contract dim 1 of both operands.
        wei = lax.dot_general(q, k, (((1,), (1,)), ((), ())),
                              preferred_element_type=jnp.float32)   # (T, T)
        wei = jnp.where(causal, wei, -jnp.inf)

        # Numerically stable softmax with f32 statistics.
        wei_max = jnp.max(wei, axis=-1, keepdims=True)
        e = jnp.exp(wei - wei_max)
        denom = jnp.sum(e, axis=-1, keepdims=True)
        inv = pl.reciprocal(denom, approx=True)
        inv = inv * (2.0 - denom * inv)      # one Newton step -> ~f32 accuracy
        p = e * inv

        out = jnp.dot(p.astype(v.dtype), v, preferred_element_type=jnp.float32)
        o_ref[r0:r0 + T, :] = out.astype(o_ref.dtype)


def _pick_batch_block(B, T, max_bb=8):
    """Batch elements per grid step; keeps Bb*T sublane-aligned (multiple of 8)."""
    if T % 8 != 0:
        return B                      # whole batch in one step -> full-dim block, always legal
    bb = 1
    for d in range(1, B + 1):
        if B % d == 0 and d <= max_bb:
            bb = d
    return bb


def head_forward(x, wk, wq, wv):
    """x: (B, T, C); wk/wq/wv: (C, H).  Returns (B, T, H) (eval-mode Head.forward)."""
    B, T, C = x.shape
    H = wk.shape[1]

    # Fuse projections and fold the attention scale into Wq (done once, outside the kernel).
    scale = jnp.asarray(H ** -0.5, dtype=wq.dtype)
    w_qkv = jnp.concatenate([wq * scale, wk, wv], axis=1)      # (C, 3H)

    Bb = _pick_batch_block(B, T)
    x2 = x.reshape(B * T, C)                                   # last-dim-preserving reshape

    kernel = functools.partial(_head_kernel, seq_len=T, head_size=H,
                               batch_block=Bb)

    out2 = pl.pallas_call(
        kernel,
        out_shape=jax.ShapeDtypeStruct((B * T, H), x.dtype),
        grid_spec=pltpu.PrefetchScalarGridSpec(
            num_scalar_prefetch=0,
            grid=(B // Bb,),
            in_specs=[
                pl.BlockSpec((Bb * T, C), lambda b: (b, 0)),   # Bb batch elements of x
                pl.BlockSpec((C, 3 * H), lambda b: (0, 0)),    # fused Wqkv (resident)
            ],
            out_specs=pl.BlockSpec((Bb * T, H), lambda b: (b, 0)),
        ),
        compiler_params=pltpu.CompilerParams(
            # Batch-block axis is independent -> sharded across TensorCores on v7x.
            dimension_semantics=("parallel",),
        ),
    )(x2, w_qkv)
    return out2.reshape(B, T, H)


def reference_forward(x, wk, wq, wv):
    """Pure-JAX reference (mirrors the PyTorch forward in eval mode)."""
    B, T, C = x.shape
    H = wk.shape[1]
    k = x @ wk
    q = x @ wq
    v = x @ wv
    wei = (q @ jnp.swapaxes(k, -2, -1)) * (H ** -0.5)
    tril = jnp.tril(jnp.ones((T, T), dtype=bool))
    wei = jnp.where(tril, wei, -jnp.inf)
    wei = jax.nn.softmax(wei, axis=-1)
    return wei @ v


if __name__ == "__main__":
    # Config-like small shapes: n_embed=32, block_size=8, head_size=16
    B, T, C, H = 2, 8, 32, 16

    key = jax.random.PRNGKey(0)
    kx, kk, kq, kv = jax.random.split(key, 4)

    x = jax.random.normal(kx, (B, T, C), dtype=jnp.float32)
    # nn.Linear weight is (H, C); store the transpose (C, H) so the kernel does x @ W.
    wk = (jax.random.normal(kk, (H, C), dtype=jnp.float32) * (C ** -0.5)).T
    wq = (jax.random.normal(kq, (H, C), dtype=jnp.float32) * (C ** -0.5)).T
    wv = (jax.random.normal(kv, (H, C), dtype=jnp.float32) * (C ** -0.5)).T

    out = jax.block_until_ready(head_forward(x, wk, wq, wv))
    ref = reference_forward(x, wk, wq, wv)

    assert out.shape == (B, T, H)
    assert jnp.allclose(out, ref, atol=1e-4, rtol=1e-4), "mismatch vs reference"

    print("KERNEL_OK")
</pallas_src>

<mosaic_0001>
module attributes {stable_mosaic.version = 11 : i64} {
  func.func @_head_kernel(%arg0: i32, %arg1: memref<16x32xf32, #tpu.memory_space<vmem>>, %arg2: memref<32x48xf32, #tpu.memory_space<vmem>>, %arg3: memref<16x16xf32, #tpu.memory_space<vmem>>) attributes {dimension_semantics = [#tpu.dimension_semantics<parallel>], iteration_bounds = array<i64: 1>, scalar_prefetch = 0 : i64, scratch_operands = 0 : i64, tpu.core_type = #tpu.core_type<tc>, window_params = [{transform_indices = @transform_0, window_bounds = array<i64: 16, 32>}, {pipeline_mode = #tpu.pipeline_mode<synchronous>, transform_indices = @transform_1, window_bounds = array<i64: 32, 48>}, {transform_indices = @transform_2, window_bounds = array<i64: 16, 16>}]} {
    %c0 = arith.constant 0 : index
    %c0_0 = arith.constant 0 : index
    %0 = vector.load %arg1[%c0, %c0_0] : memref<16x32xf32, #tpu.memory_space<vmem>>, vector<16x32xf32>
    %c0_1 = arith.constant 0 : index
    %c0_2 = arith.constant 0 : index
    %1 = vector.load %arg2[%c0_1, %c0_2] : memref<32x48xf32, #tpu.memory_space<vmem>>, vector<32x48xf32>
    %cst = arith.constant dense<0.000000e+00> : vector<16x48xf32>
    %2 = tpu.matmul %0, %1, %cst {dimension_numbers = #tpu.dot_dimension_numbers<[1], [0], [0], [1], [0, 0, 1, 1], [], []>} : vector<16x32xf32>, vector<32x48xf32>, vector<16x48xf32> -> vector<16x48xf32>
    %3 = tpu.iota {dimensions = array<i32: 0>} : vector<8x8xi32>
    %4 = tpu.iota {dimensions = array<i32: 1>} : vector<8x8xi32>
    %5 = arith.cmpi sle, %4, %3 : vector<8x8xi32>
    %6 = vector.extract_strided_slice %2 {offsets = [0, 0], sizes = [8, 16], strides = [1, 1]} : vector<16x48xf32> to vector<8x16xf32>
    %7 = vector.extract_strided_slice %2 {offsets = [0, 16], sizes = [8, 16], strides = [1, 1]} : vector<16x48xf32> to vector<8x16xf32>
    %8 = vector.extract_strided_slice %2 {offsets = [0, 32], sizes = [8, 16], strides = [1, 1]} : vector<16x48xf32> to vector<8x16xf32>
    %cst_3 = arith.constant dense<0.000000e+00> : vector<8x8xf32>
    %9 = tpu.matmul %6, %7, %cst_3 {dimension_numbers = #tpu.dot_dimension_numbers<[1], [1], [0], [0], [0, 0, 1, 0], [], []>} : vector<8x16xf32>, vector<8x16xf32>, vector<8x8xf32> -> vector<8x8xf32>
    %cst_4 = arith.constant 0xFF800000 : f32
    %10 = vector.broadcast %cst_4 : f32 to vector<8x8xf32>
    %11 = arith.select %5, %9, %10 : vector<8x8xi1>, vector<8x8xf32>
    %cst_5 = arith.constant dense<0xFF800000> : vector<8xf32>
    %12 = vector.multi_reduction <maximumf>, %11, %cst_5 [1] : vector<8x8xf32> to vector<8xf32>
    %13 = vector.shape_cast %12 : vector<8xf32> to vector<8x1xf32>
    %14 = vector.broadcast %13 : vector<8x1xf32> to vector<8x8xf32>
    %15 = arith.subf %11, %14 : vector<8x8xf32>
    %16 = math.exp %15 : vector<8x8xf32>
    %cst_6 = arith.constant dense<0.000000e+00> : vector<8xf32>
    %17 = vector.multi_reduction <add>, %16, %cst_6 [1] : vector<8x8xf32> to vector<8xf32>
    %18 = vector.shape_cast %17 : vector<8xf32> to vector<8x1xf32>
    %19 = tpu.reciprocal %18 {approx = true} : vector<8x1xf32> -> vector<8x1xf32>
    %20 = arith.mulf %18, %19 : vector<8x1xf32>
    %cst_7 = arith.constant 2.000000e+00 : f32
    %21 = vector.broadcast %cst_7 : f32 to vector<8x1xf32>
    %22 = arith.subf %21, %20 : vector<8x1xf32>
    %23 = arith.mulf %19, %22 : vector<8x1xf32>
    %24 = vector.broadcast %23 : vector<8x1xf32> to vector<8x8xf32>
    %25 = arith.mulf %16, %24 : vector<8x8xf32>
    %cst_8 = arith.constant dense<0.000000e+00> : vector<8x16xf32>
    %26 = tpu.matmul %25, %8, %cst_8 {dimension_numbers = #tpu.dot_dimension_numbers<[1], [0], [0], [1], [0, 0, 1, 1], [], []>} : vector<8x8xf32>, vector<8x16xf32>, vector<8x16xf32> -> vector<8x16xf32>
    %c0_9 = arith.constant 0 : index
    %c0_10 = arith.constant 0 : index
    %27 = vector.load %arg3[%c0_9, %c0_10] : memref<16x16xf32, #tpu.memory_space<vmem>>, vector<8x16xf32>
    tpu.vector_store %arg3[%c0_9, %c0_10], %26 {strides = array<i32>} : memref<16x16xf32, #tpu.memory_space<vmem>>, vector<8x16xf32>,
    %28 = vector.extract_strided_slice %2 {offsets = [8, 0], sizes = [8, 16], strides = [1, 1]} : vector<16x48xf32> to vector<8x16xf32>
    %29 = vector.extract_strided_slice %2 {offsets = [8, 16], sizes = [8, 16], strides = [1, 1]} : vector<16x48xf32> to vector<8x16xf32>
    %30 = vector.extract_strided_slice %2 {offsets = [8, 32], sizes = [8, 16], strides = [1, 1]} : vector<16x48xf32> to vector<8x16xf32>
    %cst_11 = arith.constant dense<0.000000e+00> : vector<8x8xf32>
    %31 = tpu.matmul %28, %29, %cst_11 {dimension_numbers = #tpu.dot_dimension_numbers<[1], [1], [0], [0], [0, 0, 1, 0], [], []>} : vector<8x16xf32>, vector<8x16xf32>, vector<8x8xf32> -> vector<8x8xf32>
    %cst_12 = arith.constant 0xFF800000 : f32
    %32 = vector.broadcast %cst_12 : f32 to vector<8x8xf32>
    %33 = arith.select %5, %31, %32 : vector<8x8xi1>, vector<8x8xf32>
    %cst_13 = arith.constant dense<0xFF800000> : vector<8xf32>
    %34 = vector.multi_reduction <maximumf>, %33, %cst_13 [1] : vector<8x8xf32> to vector<8xf32>
    %35 = vector.shape_cast %34 : vector<8xf32> to vector<8x1xf32>
    %36 = vector.broadcast %35 : vector<8x1xf32> to vector<8x8xf32>
    %37 = arith.subf %33, %36 : vector<8x8xf32>
    %38 = math.exp %37 : vector<8x8xf32>
    %cst_14 = arith.constant dense<0.000000e+00> : vector<8xf32>
    %39 = vector.multi_reduction <add>, %38, %cst_14 [1] : vector<8x8xf32> to vector<8xf32>
    %40 = vector.shape_cast %39 : vector<8xf32> to vector<8x1xf32>
    %41 = tpu.reciprocal %40 {approx = true} : vector<8x1xf32> -> vector<8x1xf32>
    %42 = arith.mulf %40, %41 : vector<8x1xf32>
    %cst_15 = arith.constant 2.000000e+00 : f32
    %43 = vector.broadcast %cst_15 : f32 to vector<8x1xf32>
    %44 = arith.subf %43, %42 : vector<8x1xf32>
    %45 = arith.mulf %41, %44 : vector<8x1xf32>
    %46 = vector.broadcast %45 : vector<8x1xf32> to vector<8x8xf32>
    %47 = arith.mulf %38, %46 : vector<8x8xf32>
    %cst_16 = arith.constant dense<0.000000e+00> : vector<8x16xf32>
    %48 = tpu.matmul %47, %30, %cst_16 {dimension_numbers = #tpu.dot_dimension_numbers<[1], [0], [0], [1], [0, 0, 1, 1], [], []>} : vector<8x8xf32>, vector<8x16xf32>, vector<8x16xf32> -> vector<8x16xf32>
    %c8 = arith.constant 8 : index
    %c0_17 = arith.constant 0 : index
    %49 = vector.load %arg3[%c8, %c0_17] : memref<16x16xf32, #tpu.memory_space<vmem>>, vector<8x16xf32>
    tpu.vector_store %arg3[%c8, %c0_17], %48 {strides = array<i32>} : memref<16x16xf32, #tpu.memory_space<vmem>>, vector<8x16xf32>,
    return
  }
  func.func @transform_0(%arg0: i32) -> (i32, i32) {
    %c0_i32 = arith.constant 0 : i32
    %c0_i32_0 = arith.constant 0 : i32
    return %arg0, %c0_i32 : i32, i32
  }
  func.func @transform_1(%arg0: i32) -> (i32, i32) {
    %c0_i32 = arith.constant 0 : i32
    %c0_i32_0 = arith.constant 0 : i32
    %c0_i32_1 = arith.constant 0 : i32
    return %c0_i32, %c0_i32_0 : i32, i32
  }
  func.func @transform_2(%arg0: i32) -> (i32, i32) {
    %c0_i32 = arith.constant 0 : i32
    %c0_i32_0 = arith.constant 0 : i32
    return %arg0, %c0_i32 : i32, i32
  }
}

</mosaic_0001>

<bundles_post_ra>
// kernel: tpu_custom_call.1
= control target key start
LH: loop header
LB: loop body
LE: loop exit
PB: predicated region body
PF: predicated region fallthrough
CT: control target
= control target key end

     0   :  { %7 = vsyncpa [#allocation3], 0  ;;  %s734_s0 = inlined_call_operand.hbm [shape: f32[16,32], index: 0, kind: input, shape index: {}]   ;;  %s735_s1 = inlined_call_operand.hbm [shape: f32[32,48], index: 1, kind: input, shape index: {}]   ;;  %s736_s2 = inlined_call_operand.hbm [shape: f32[16,16], index: 2, kind: output, shape index: {}]  }
   0x1   :  { %8 = vsyncpa [#allocation6], 0 }
   0x2   :  { %9 = vsyncpa [#allocation4], 0  ;;  %s641_s9 = smov [#allocation2]   ;;  %s569_s13 = scalar_lea.hbm %s734_s0, 256 }
   0x3   :  { %s15_s10 = sshll.u32 %s641_s9, 4  ;;  %p570_p0 = scmp.ne.s32.totalorder %s734_s0, %s569_s13  ;;  %s16_s10 = int_to_ptr.vmem [resolvable:$true] %s15_s10 }
   0x4   :  { %p573_p1 = scmp.lt.u32.totalorder %s569_s13, %s734_s0 }
   0x6   :  { %p575_p2 = pnand %p573_p1, %p570_p0 }
   0x8   :  { %578 = shalt.err (!%p575_p2)
}
   0x9   :  { %s579_s18 = scalar_lea.vmem %s16_s10, 256  ;;  %p584_p4 = scmp.lt.s32.totalorder %s16_s10, %s16_s10 }
   0xa   :  { %p580_p3 = scmp.ne.s32.totalorder %s16_s10, %s579_s18  ;;  %p585_p5 = scmp.lt.s32.totalorder %s579_s18, %s579_s18 }
   0xc   :  { %p586_p6 = por %p585_p5, %p584_p4 }
   0xe   :  { %p587_p7 = pnand %p586_p6, %p580_p3 }
  0x10   :  { %590 = shalt.err (!%p587_p7)
}
  0x11   :  { %s642_s19 = smov 128   ;;  %s643_s20 = smov 8  }
  0x12   :  { %21 = dma.hbm_to_vmem [thread:$0]  %s734_s0, 256, %s16_s10, [#allocation3], %s642_s19, %s642_s19, %s643_s20  }
  0x13   :  { %s644_s23 = smov [#allocation5]   ;;  %s591_s27 = scalar_lea.hbm %s735_s1, 512 }
  0x14   :  { %s27_s24 = sshll.u32 %s644_s23, 4  ;;  %p592_p8 = scmp.ne.s32.totalorder %s735_s1, %s591_s27  ;;  %s28_s24 = int_to_ptr.vmem [resolvable:$true] %s27_s24 }
  0x15   :  { %p595_p9 = scmp.lt.u32.totalorder %s591_s27, %s735_s1 }
  0x17   :  { %p597_p10 = pnand %p595_p9, %p592_p8 }
  0x19   :  { %600 = shalt.err (!%p597_p10)
}
  0x1a   :  { %s601_s4 = scalar_lea.vmem %s28_s24, 512  ;;  %p606_p12 = scmp.lt.s32.totalorder %s28_s24, %s28_s24 }
  0x1b   :  { %p602_p11 = scmp.ne.s32.totalorder %s28_s24, %s601_s4  ;;  %p607_p13 = scmp.lt.s32.totalorder %s601_s4, %s601_s4 }
  0x1d   :  { %p608_p0 = por %p607_p13, %p606_p12 }
  0x1f   :  { %p609_p1 = pnand %p608_p0, %p602_p11 }
  0x21   :  { %612 = shalt.err (!%p609_p1)
}
  0x22   :  { %33 = dma.hbm_to_vmem [thread:$0]  %s735_s1, 512, %s28_s24, [#allocation6], %s642_s19, %s642_s19, %s643_s20  }
  0x23   :  { %635 = dma.done.wait [#allocation3], 256  }
  0x24   :  { %636 = vsyncadd [#allocation3], 4294967040 }
  0x25   :  { %637 = dma.done.wait [#allocation6], 512  }
  0x26   :  { %638 = vsyncadd [#allocation6], 4294966784  ;;  %vm46_vm0 = vcmask 261120   ;;  %v42_v0 = vld [vmem:[#allocation5] sm:$0xff]  ;;  %v43_v1 = vld [vmem:[#allocation5 + $0x8] sm:$0xff]  ;;  %v645_v8 = vmov 0.0   ;;  %v128_v13 = vlaneseq }
  0x27   :  { %v44_v2 = vld [vmem:[#allocation5 + $0x10] sm:$0xff]  ;;  %v544_v3 = vpack.c.bf16 %v43_v1, %v42_v0  ;;  %v45_v4 = vld [vmem:[#allocation5 + $0x18] sm:$0xff]  ;;  %524 = vmatprep.subr.mxu1 %v645_v8  ;;  %vm646_vm1 = vmmov 0   ;;  %s647_s1 = smov 112   ;;  %vm136_vm2 = vcmask 130048   ;;  %vm212_vm4 = vcmask 64512  }
  0x28   :  { %v40_v5 = vld [vmem:[#allocation2] sm:$0xff]  ;;  %v548_v6 = vpack.c.bf16 %v45_v4, %v44_v2  ;;  %v41_v7 = vld [vmem:[#allocation2 + $0x8] sm:$0xff]  ;;  %526 = vmatprep.mubr.msk.f32.mxu1 %vm646_vm1, %v645_v8  ;;  %v129_v14 = vshrl.u32 %v128_v13, 7  ;;  %v131_v15 = vand.u32 127, %v128_v13  ;;  %s648_s6 = smov 96   ;;  %s649_s7 = smov [#allocation7]  }
  0x29   :  { %521 = vmatprep.mubr.msk.f32.mxu0 %vm46_vm0, %v40_v5  ;;  %545 = vmatprep.subr.bf16.mxu0 %v544_v3  ;;  %s478_s8 = sshll.u32 %s649_s7, 4  ;;  %s479_s8 = int_to_ptr.vmem [resolvable:$true] %s478_s8 }
  0x2a   :  { %547 = vmatpush3.bf16.msra.mxu0 %v544_v3  ;;  %vm132_vm3 = vcmp.le.s32.totalorder %v131_v15, %v129_v14  ;;  %s613_s9 = scalar_lea.vmem %s479_s8, 256  ;;  %p618_p3 = scmp.lt.s32.totalorder %s479_s8, %s479_s8 }
  0x2b   :  { %549 = vmatprep.subr.bf16.mxu0 %v548_v6  ;;  %p614_p2 = scmp.ne.s32.totalorder %s479_s8, %s613_s9  ;;  %p619_p4 = scmp.lt.s32.totalorder %s613_s9, %s613_s9 }
  0x2d   :  { %p620_p5 = por %p619_p4, %p618_p3 }
  0x2e   :  { %551 = vmatpush3.bf16.msra.mxu0 %v548_v6 }
  0x2f   :  { %534 = vmatprep.subr.mxu0 %v645_v8  ;;  %p621_p6 = pnand %p620_p5, %p614_p2 }
  0x31   :  { %522 = vmatmul.mubr.msk.f32.vlgmr.msra.gmra.mrb[0].mxu0 %vm46_vm0, %v41_v7 }
  0x32   :  { %536 = vmatprep.mubr.msk.f32.mxu0 %vm646_vm1, %v645_v8 }
 0x104   :  { %v523_v9 = vpop.f32.mrb[0].mxu0 }
 0x105   :  { %v119_v10 = vpop.f32.mrb[1].mxu0 }
 0x106   :  { %134 = vrot.lane.b32.xlu0 %v119_v10, %s647_s1 }
 0x10a   :  { %305 = vrot.lane.b32.xlu0 %v523_v9, %s647_s1 }
 0x178   :  { %v135_v11 = vpop.permute.xlu0 %134 }
 0x179   :  { %525 = vmatpush3.xpose.msk.msra.mxu1 %vm136_vm2, %v135_v11 }
 0x17a   :  { %529 = vmatprep.subr.mxu1 %v645_v8 }
 0x17c   :  { %527 = vmatmul.mubr.msk.f32.vlgmr.msra.gmra.mrb[0].mxu1 %vm136_vm2, %v119_v10  ;;  %v306_v12 = vpop.permute.xlu0 %305 }
 0x17d   :  { %535 = vmatpush3.xpose.msk.msra.mxu0 %vm136_vm2, %v306_v12  ;;  %531 = vmatprep.mubr.msk.f32.mxu1 %vm646_vm1, %v645_v8 }
 0x180   :  { %537 = vmatmul.mubr.msk.f32.vlgmr.msra.gmra.mrb[2].mxu0 %vm136_vm2, %v523_v9 }
 0x24f   :  { %v207_v16 = vpop.f32.mrb[0].mxu1 }
 0x250   :  { %v211_v17 = vsel %vm132_vm3, %v207_v16, -inf  ;;  %v528_v18 = vpop.f32.mrb[1].mxu1 }
 0x251   :  { %v213_v19 = vsel %vm212_vm4, %v211_v17, -inf }
 0x252   :  { %214 = vmax.xlane.f32.xlu1 %v213_v19 }
 0x253   :  { %v377_v20 = vpop.f32.mrb[2].mxu0 }
 0x254   :  { %v381_v21 = vsel %vm132_vm3, %v377_v20, -inf  ;;  %v538_v22 = vpop.f32.mrb[3].mxu0 }
 0x255   :  { %v382_v23 = vsel %vm212_vm4, %v381_v21, -inf }
 0x256   :  { %383 = vmax.xlane.f32.xlu1 %v382_v23 }
 0x2df   :  { %v215_v24 = vpop.xlane.xlu1 %214 }
 0x2e0   :  { %v216_v25 = vsub.f32 %v211_v17, %v215_v24 }
 0x2e2   :  { %v217_v26 = vmul.f32 1.442695, %v216_v25 }
 0x2e3   :  { %v384_v27 = vpop.xlane.xlu1 %383 }
 0x2e4   :  { %561 = vpow2.f32 %v217_v26  ;;  %v385_v28 = vsub.f32 %v381_v21, %v384_v27 }
 0x2e6   :  { %v386_v29 = vmul.f32 1.442695, %v385_v28 }
 0x2e8   :  { %563 = vpow2.f32 %v386_v29 }
 0x2ee   :  { %v562_v30 = vpop.eup %561 }
 0x2ef   :  { %v219_v31 = vsel %vm212_vm4, %v562_v30, 0.0 }
 0x2f0   :  { %220 = vadd.xlane.f32.xlu0 %v219_v31 }
 0x2f2   :  { %v564_v32 = vpop.eup %563 }
 0x2f3   :  { %v388_v33 = vsel %vm212_vm4, %v564_v32, 0.0 }
 0x2f4   :  { %389 = vadd.xlane.f32.xlu1 %v388_v33 }
 0x305   :  { %227 = vrot.lane.b32.xlu1 %v119_v10, %s648_s6 }
 0x309   :  { %396 = vrot.lane.b32.xlu1 %v523_v9, %s648_s6 }
 0x37d   :  { %v221_v34 = vpop.xlane.xlu0 %220 }
 0x37e   :  { %565 = vrcp.f32 %v221_v34 }
 0x381   :  { %v390_v35 = vpop.xlane.xlu1 %389 }
 0x382   :  { %567 = vrcp.f32 %v390_v35 }
 0x385   :  { %v228_v36 = vpop.permute.xlu1 %227 }
 0x386   :  { %530 = vmatpush3.msra.mxu1 %v228_v36 }
 0x387   :  { %539 = vmatprep.subr.mxu1 %v645_v8 }
 0x388   :  { %v566_v37 = vpop.eup %565 }
 0x389   :  { %v223_v38 = vmul.f32 %v566_v37, %v221_v34  ;;  %v397_v46 = vpop.permute.xlu1 %396 }
 0x38b   :  { %v224_v39 = vsub.f32 2.0, %v223_v38 }
 0x38c   :  { %v568_v40 = vpop.eup %567 }
 0x38d   :  { %v225_v41 = vmul.f32 %v566_v37, %v224_v39  ;;  %v392_v42 = vmul.f32 %v568_v40, %v390_v35 }
 0x38f   :  { %v226_v43 = vmul.f32 %v562_v30, %v225_v41  ;;  %v393_v44 = vsub.f32 2.0, %v392_v42 }
 0x391   :  { %v394_v45 = vmul.f32 %v568_v40, %v393_v44  ;;  %532 = vmatmul.mubr.msk.f32.vlgmr.msra.gmra.mrb[2].mxu1 %vm212_vm4, %v226_v43 }
 0x392   :  { %540 = vmatpush3.msra.mxu1 %v397_v46  ;;  %541 = vmatprep.mubr.msk.f32.mxu1 %vm646_vm1, %v645_v8 }
 0x393   :  { %v395_v47 = vmul.f32 %v564_v32, %v394_v45 }
 0x395   :  { %542 = vmatmul.mubr.msk.f32.vlgmr.msra.gmra.mrb[4].mxu1 %vm212_vm4, %v395_v47 }
 0x464   :  { %v299_v48 = vpop.f32.mrb[2].mxu1 }
 0x465   :  { %303 = vst.msk [vmem:[#allocation7] sm:$0xff] %vm136_vm2, %v299_v48  ;;  %v533_v49 = vpop.f32.mrb[3].mxu1 }
 0x468   :  { %v468_v50 = vpop.f32.mrb[4].mxu1 }
 0x469   :  { %472 = vst.msk [vmem:[#allocation7 + $0x8] sm:$0xff] %vm136_vm2, %v468_v50  ;;  %v543_v51 = vpop.f32.mrb[5].mxu1 }
 0x46a   :  { %624 = shalt.err (!%p621_p6)
}
 0x46b   :  { %s625_s12 = scalar_lea.hbm %s736_s2, 256 }
 0x46c   :  { %p626_p7 = scmp.ne.s32.totalorder %s736_s2, %s625_s12  ;;  %p629_p8 = scmp.lt.u32.totalorder %s625_s12, %s736_s2 }
 0x46e   :  { %p631_p9 = pnand %p629_p8, %p626_p7 }
 0x470   :  { %634 = shalt.err (!%p631_p9)
}
 0x471   :  { %484 = dma.vmem_to_hbm [thread:$0]  %s479_s8, 256, %s736_s2, [#allocation4], %s642_s19, %s642_s19, %s643_s20  }
 0x472   :  { %639 = dma.done.wait [#allocation4], 256  }
 0x473   :  { %640 = vsyncadd [#allocation4], 4294967040 }
 0x474   :  { %488 = vsyncpa [#allocation3], 1 }
 0x475   :  { %489 = vsyncpa [#allocation6], 1 }
 0x476   :  { %490 = vsyncpa [#allocation4], 1 }

</bundles_post_ra>
